<compile_context>
chip_gen: v7x
topology: tpu7x:2x2x1
jax: 0.10.0
libtpu: 0.0.40
codegen_flags: <defaults>
</compile_context>

<pallas_src>
import jax
import jax.numpy as jnp
from jax.experimental import pallas as pl
from jax.experimental.pallas import tpu as pltpu

# ----------------------------------------------------------------------------------
# Irreps config (matches the module's docstring example + scalar biases)
#   irreps_in  = "4x0e + 16x1o"   dim = 4*1 + 16*3 = 52
#   irreps_out = "8x0e + 8x1o"    dim = 8*1 + 8*3  = 32
# ----------------------------------------------------------------------------------
IRREPS_IN = [(4, 0, 1), (16, 1, -1)]   # (mul, l, parity)
IRREPS_OUT = [(8, 0, 1), (8, 1, -1)]
BIASES = True                          # bias on scalar (0e) outputs, like biases=True
ALPHA, R = 16, 16                      # ELoRA hyper-params from __init__

PACK = 4                               # logical rows packed per physical row
TM = 2048                              # max row-tile size (packed rows) per grid step


def ir_dim(l):
    return 2 * l + 1


def irreps_dim(irreps):
    return sum(mul * ir_dim(l) for mul, l, _ in irreps)


def irreps_slices(irreps):
    s, out = 0, []
    for mul, l, _ in irreps:
        d = mul * ir_dim(l)
        out.append((s, d))
        s += d
    return out


def build_instructions(irreps_in, irreps_out, biases):
    """Replicates Linear.__init__ instruction construction (path_normalization='element')."""
    pairs = [(i_in, i_out)
             for i_in, (_, l_in, p_in) in enumerate(irreps_in)
             for i_out, (_, l_out, p_out) in enumerate(irreps_out)
             if (l_in, p_in) == (l_out, p_out)]
    ins = [dict(i_in=i, i_out=o,
                path_shape=(irreps_in[i][0], irreps_out[o][0]),
                path_weight=1.0)
           for i, o in pairs]

    def alpha(cur):
        x = sum(irreps_in[j["i_in"]][0] for j in ins if j["i_out"] == cur["i_out"])
        return 1.0 if x == 0 else float(x)

    ins = [dict(i_in=j["i_in"], i_out=j["i_out"], path_shape=j["path_shape"],
                path_weight=alpha(j) ** (-0.5)) for j in ins]

    # bias instructions (scalars only)
    for i_out, (mul, l, p) in enumerate(irreps_out):
        if biases and l == 0 and p == 1:
            ins.append(dict(i_in=-1, i_out=i_out,
                            path_shape=(mul * ir_dim(l),), path_weight=1.0))
    return ins


# ----------------------------------------------------------------------------------
# Glue: fold the per-instruction weights into one (din, dout) matrix + bias vector
# ----------------------------------------------------------------------------------
def expand_to_matrix(weight_flat, bias_flat, irreps_in, irreps_out, instructions):
    din, dout = irreps_dim(irreps_in), irreps_dim(irreps_out)
    sl_in, sl_out = irreps_slices(irreps_in), irreps_slices(irreps_out)
    M = jnp.zeros((din, dout), jnp.float32)
    bvec = jnp.zeros((dout,), jnp.float32)
    w_off = 0
    b_off = 0
    for ins in instructions:
        i_out = ins["i_out"]
        so, lo = sl_out[i_out]
        if ins["i_in"] == -1:
            n = ins["path_shape"][0]
            bvec = bvec.at[so:so + lo].add(ins["path_weight"] * bias_flat[b_off:b_off + n])
            b_off += n
        else:
            mul_in, l_in, _ = irreps_in[ins["i_in"]]
            mul_out, _, _ = irreps_out[i_out]
            d = ir_dim(l_in)
            n = mul_in * mul_out
            w = weight_flat[w_off:w_off + n].reshape(mul_in, mul_out)
            w_off += n
            si, li = sl_in[ins["i_in"]]
            # einsum 'uw,zui->zwi' == (x_seg reshaped (z, u*i)) @ (W (x) I_d)
            block = ins["path_weight"] * jnp.kron(w, jnp.eye(d, dtype=w.dtype))
            M = M.at[si:si + li, so:so + lo].add(block)
    return M, bvec


def pack_weight_bias(M, bvec, pack):
    """blockdiag(M, ..., M) (pack copies, bf16) and the bias tiled `pack` times (f32)."""
    din, dout = M.shape
    eye = jnp.eye(pack, dtype=M.dtype)
    Wp = jnp.kron(eye, M).astype(jnp.bfloat16)            # (pack*din, pack*dout), ~52 KB
    bp = jnp.tile(bvec.reshape(1, dout), (1, pack)).astype(jnp.float32)   # (1, pack*dout)
    return Wp, bp


# ----------------------------------------------------------------------------------
# Pallas kernel: row-tiled  out = x @ W + bias ;  W/bias stay VMEM-resident
# ----------------------------------------------------------------------------------
def _linear_kernel(x_ref, w_ref, b_ref, o_ref):
    # Down-cast the activation tile to bf16 in VMEM (no extra HBM pass; keeps
    # the MXU in its fast bf16 mode on v5e). f32 accumulation + f32 bias add.
    x = x_ref[...].astype(jnp.bfloat16)
    acc = jnp.dot(x, w_ref[...], preferred_element_type=jnp.float32)
    o_ref[...] = (acc + b_ref[...]).astype(o_ref.dtype)


def e3nn_linear_pallas(features, big_w_packed, bias_packed, *,
                       pack=PACK, tm=TM, out_dtype=None):
    lead = features.shape[:-1]
    din = features.shape[-1]
    k, dout_p = big_w_packed.shape          # (pack*din, pack*dout)
    assert k == pack * din
    dout = dout_p // pack
    out_dtype = features.dtype if out_dtype is None else jnp.dtype(out_dtype)

    n = 1
    for d in lead:
        n *= d
    if n == 0:                               # empty batch guard
        return jnp.zeros((*lead, dout), out_dtype)

    x2d = features.reshape(n, din)

    # ---- balanced row tiling over packed rows ----
    n_pack = pl.cdiv(n, pack)
    num_tiles = max(1, pl.cdiv(n_pack, tm))
    # v7x: prefer an even number of equal tiles so both TensorCores get work,
    # but only when each tile still holds >= 8 packed rows (padding stays tiny).
    if num_tiles % 2 == 1 and n_pack >= 16:
        num_tiles += 1
    tm_eff = ((pl.cdiv(n_pack, num_tiles) + 7) // 8) * 8   # balanced, multiple of 8
    rows_pad = num_tiles * tm_eff
    pad_flat = rows_pad * pack - n
    if pad_flat:
        x2d = jnp.pad(x2d, ((0, pad_flat), (0, 0)))
    xp = x2d.reshape(rows_pad, k)            # lane-dense packed input, native dtype
    wb = big_w_packed.astype(jnp.bfloat16)   # no-op if already bf16; ~52 KB resident
    bb = bias_packed.astype(jnp.float32)

    x_bytes = jnp.dtype(xp.dtype).itemsize
    o_bytes = jnp.dtype(out_dtype).itemsize

    out = pl.pallas_call(
        _linear_kernel,
        out_shape=jax.ShapeDtypeStruct((rows_pad, dout_p), out_dtype),
        grid=(num_tiles,),
        in_specs=[
            pl.BlockSpec((tm_eff, k), lambda i: (i, 0)),       # row-tiled activations
            pl.BlockSpec((k, dout_p), lambda i: (0, 0)),       # resident packed weight
            pl.BlockSpec((1, dout_p), lambda i: (0, 0)),       # resident packed bias
        ],
        out_specs=pl.BlockSpec((tm_eff, dout_p), lambda i: (i, 0)),
        compiler_params=pltpu.CompilerParams(
            dimension_semantics=("parallel",),                 # megacore-shardable rows
            vmem_limit_bytes=32 * 1024 * 1024,
        ),
        cost_estimate=pl.CostEstimate(
            flops=2 * rows_pad * k * dout_p,
            transcendentals=0,
            bytes_accessed=rows_pad * (k * x_bytes + dout_p * o_bytes)
            + k * dout_p * 2 + dout_p * 4,
        ),
    )(xp, wb, bb)

    out = out.reshape(rows_pad * pack, dout)
    if pad_flat:
        out = out[:n]                        # tiny with balanced tiles; skipped if exact
    return out.reshape(*lead, dout)


# ----------------------------------------------------------------------------------
# Pure-JAX reference mirroring _codegen_linear (f32, for correctness assert)
# ----------------------------------------------------------------------------------
def reference_forward(features, weight_flat, bias_flat, irreps_in, irreps_out, instructions):
    lead = features.shape[:-1]
    x = features.reshape(-1, irreps_dim(irreps_in))
    n = x.shape[0]
    sl_in = irreps_slices(irreps_in)
    chunks = [jnp.zeros((n, mul * ir_dim(l)), features.dtype) for mul, l, _ in irreps_out]
    w_off = 0
    b_off = 0
    for ins in instructions:
        i_out = ins["i_out"]
        mul_out, _, _ = irreps_out[i_out]
        if ins["i_in"] == -1:
            nb = ins["path_shape"][0]
            b = bias_flat[b_off:b_off + nb]
            b_off += nb
            chunks[i_out] = chunks[i_out] + ins["path_weight"] * b[None, :]
        else:
            mul_in, l_in, _ = irreps_in[ins["i_in"]]
            d = ir_dim(l_in)
            si, li = sl_in[ins["i_in"]]
            xin = x[:, si:si + li].reshape(n, mul_in, d)
            nw = mul_in * mul_out
            w = weight_flat[w_off:w_off + nw].reshape(mul_in, mul_out)
            w_off += nw
            eo = ins["path_weight"] * jnp.einsum("uw,zui->zwi", w, xin)
            chunks[i_out] = chunks[i_out] + eo.reshape(n, mul_out * d)
    return jnp.concatenate(chunks, axis=-1).reshape(*lead, irreps_dim(irreps_out))


# ----------------------------------------------------------------------------------
if __name__ == "__main__":
    instructions = build_instructions(IRREPS_IN, IRREPS_OUT, BIASES)
    weight_instructions = [ins for ins in instructions if ins["i_in"] != -1]
    weight_numel = sum(ins["path_shape"][0] * ins["path_shape"][1] for ins in weight_instructions)
    bias_numel = sum(ins["path_shape"][0] for ins in instructions if ins["i_in"] == -1)

    key = jax.random.PRNGKey(0)
    k_w, k_x, k_x2, k_lora = jax.random.split(key, 4)

    # Parameters (deterministic, per __init__): weight ~ randn, bias = zeros,
    # LoRA A ~ randn, LoRA B = zeros.
    weight = jax.random.normal(k_w, (weight_numel,), jnp.float32)
    bias = jnp.zeros((bias_numel,), jnp.float32)

    lora_keys = jax.random.split(k_lora, len(weight_instructions))
    lora_deltas = []
    for ins, kk in zip(weight_instructions, lora_keys):
        mul_in, mul_out = ins["path_shape"]
        A = jax.random.normal(kk, (mul_in, R), jnp.float32)
        B = jnp.zeros((R, mul_out), jnp.float32)       # zero-init per __init__
        lora_deltas.append((A @ B).reshape(-1))
    # forward(): weight = weight + alpha/r * cat(A @ B)
    weight_eff = weight + (ALPHA / R) * jnp.concatenate(lora_deltas, axis=-1)

    # Fold into dense block matrix + bias vector, then pack PACK copies (host-side glue)
    big_w, bias_full = expand_to_matrix(weight_eff, bias, IRREPS_IN, IRREPS_OUT, instructions)
    big_w_packed, bias_packed = pack_weight_bias(big_w, bias_full, PACK)

    din, dout = irreps_dim(IRREPS_IN), irreps_dim(IRREPS_OUT)

    # --- small example: (batch=2, seq=8, 52), f32 in / f32 out ---
    features = jax.random.normal(k_x, (2, 8, din), jnp.float32)
    out = e3nn_linear_pallas(features, big_w_packed, bias_packed)
    out = jax.block_until_ready(out)
    ref = reference_forward(features, weight_eff, bias, IRREPS_IN, IRREPS_OUT, instructions)
    assert out.shape == (2, 8, dout)
    # bf16 weights / bf16 MXU with f32 accumulation -> relaxed tolerance vs f32 reference
    assert jnp.allclose(out, ref, atol=5e-2, rtol=5e-2), "mismatch vs reference (small)"

    # --- ragged / multi-tile example: grid>=2 balanced tiles, bf16 in / bf16 out fast path ---
    features2 = jax.random.normal(k_x2, (3, 700, din), jnp.float32)
    out2 = e3nn_linear_pallas(features2.astype(jnp.bfloat16), big_w_packed, bias_packed,
                              out_dtype=jnp.bfloat16)
    out2 = jax.block_until_ready(out2)
    ref2 = reference_forward(features2, weight_eff, bias, IRREPS_IN, IRREPS_OUT, instructions)
    assert out2.shape == (3, 700, dout)
    assert jnp.allclose(out2.astype(jnp.float32), ref2, atol=5e-2, rtol=5e-2), \
        "mismatch vs reference (tiled)"

    # TODO(synk): f_in/f_out (batched feature channels) and shared_weights=False
    # (per-sample weights) variants of e3nn Linear are not implemented here.
    print("KERNEL_OK")
</pallas_src>

<mosaic_0001>
module attributes {stable_mosaic.version = 11 : i64} {
  func.func @_linear_kernel(%arg0: i32, %arg1: memref<8x208xf32, #tpu.memory_space<vmem>>, %arg2: memref<208x128xbf16, #tpu.memory_space<vmem>>, %arg3: memref<1x128xf32, #tpu.memory_space<vmem>>, %arg4: memref<8x128xf32, #tpu.memory_space<vmem>>) attributes {dimension_semantics = [#tpu.dimension_semantics<parallel>], iteration_bounds = array<i64: 1>, scalar_prefetch = 0 : i64, scratch_operands = 0 : i64, tpu.core_type = #tpu.core_type<tc>, window_params = [{transform_indices = @transform_0, window_bounds = array<i64: 8, 208>}, {pipeline_mode = #tpu.pipeline_mode<synchronous>, transform_indices = @transform_1, window_bounds = array<i64: 208, 128>}, {pipeline_mode = #tpu.pipeline_mode<synchronous>, transform_indices = @transform_2, window_bounds = array<i64: 1, 128>}, {transform_indices = @transform_3, window_bounds = array<i64: 8, 128>}]} {
    %c0 = arith.constant 0 : index
    %c0_0 = arith.constant 0 : index
    %0 = vector.load %arg1[%c0, %c0_0] : memref<8x208xf32, #tpu.memory_space<vmem>>, vector<8x208xf32>
    %1 = arith.truncf %0 : vector<8x208xf32> to vector<8x208xbf16>
    %c0_1 = arith.constant 0 : index
    %c0_2 = arith.constant 0 : index
    %2 = vector.load %arg2[%c0_1, %c0_2] : memref<208x128xbf16, #tpu.memory_space<vmem>>, vector<208x128xbf16>
    %cst = arith.constant dense<0.000000e+00> : vector<8x128xf32>
    %3 = tpu.matmul %1, %2, %cst {dimension_numbers = #tpu.dot_dimension_numbers<[1], [0], [0], [1], [0, 0, 1, 1], [], []>} : vector<8x208xbf16>, vector<208x128xbf16>, vector<8x128xf32> -> vector<8x128xf32>
    %c0_3 = arith.constant 0 : index
    %c0_4 = arith.constant 0 : index
    %4 = vector.load %arg3[%c0_3, %c0_4] : memref<1x128xf32, #tpu.memory_space<vmem>>, vector<1x128xf32>
    %5 = vector.broadcast %4 : vector<1x128xf32> to vector<8x128xf32>
    %6 = arith.addf %3, %5 : vector<8x128xf32>
    %c0_5 = arith.constant 0 : index
    %c0_6 = arith.constant 0 : index
    %7 = vector.load %arg4[%c0_5, %c0_6] : memref<8x128xf32, #tpu.memory_space<vmem>>, vector<8x128xf32>
    tpu.vector_store %arg4[%c0_5, %c0_6], %6 {strides = array<i32>} : memref<8x128xf32, #tpu.memory_space<vmem>>, vector<8x128xf32>,
    return
  }
  func.func @transform_0(%arg0: i32) -> (i32, i32) {
    %c0_i32 = arith.constant 0 : i32
    %c0_i32_0 = arith.constant 0 : i32
    return %arg0, %c0_i32 : i32, i32
  }
  func.func @transform_1(%arg0: i32) -> (i32, i32) {
    %c0_i32 = arith.constant 0 : i32
    %c0_i32_0 = arith.constant 0 : i32
    %c0_i32_1 = arith.constant 0 : i32
    return %c0_i32, %c0_i32_0 : i32, i32
  }
  func.func @transform_2(%arg0: i32) -> (i32, i32) {
    %c0_i32 = arith.constant 0 : i32
    %c0_i32_0 = arith.constant 0 : i32
    %c0_i32_1 = arith.constant 0 : i32
    return %c0_i32, %c0_i32_0 : i32, i32
  }
  func.func @transform_3(%arg0: i32) -> (i32, i32) {
    %c0_i32 = arith.constant 0 : i32
    %c0_i32_0 = arith.constant 0 : i32
    return %arg0, %c0_i32 : i32, i32
  }
}

</mosaic_0001>

<bundles_post_ra>
// kernel: tpu_custom_call.1
= control target key start
LH: loop header
LB: loop body
LE: loop exit
PB: predicated region body
PF: predicated region fallthrough
CT: control target
= control target key end

     0   :  { %8 = vsyncpa [#allocation3], 0  ;;  %s396_s0 = inlined_call_operand.hbm [shape: f32[8,208], index: 0, kind: input, shape index: {}]   ;;  %s397_s1 = inlined_call_operand.hbm [shape: bf16[208,128], index: 1, kind: input, shape index: {}]   ;;  %s398_s2 = inlined_call_operand.vmem [shape: f32[1,128], index: 2, kind: input, shape index: {}]   ;;  %s399_s3 = inlined_call_operand.hbm [shape: f32[8,128], index: 3, kind: output, shape index: {}]  }
   0x1   :  { %9 = vsyncpa [#allocation6], 0 }
   0x2   :  { %10 = vsyncpa [#allocation4], 0  ;;  %s324_s12 = smov [#allocation2]   ;;  %s325_s14 = smov [#allocation5]  }
   0x3   :  { %s17_s13 = sshll.u32 %s324_s12, 4  ;;  %s26_s15 = sshll.u32 %s325_s14, 4  ;;  %s18_s13 = int_to_ptr.vmem [resolvable:$true] %s17_s13  ;;  %s350_s15 = int_to_ptr.vmem [resolvable:$true] %s26_s15 }
   0x4   :  { %s252_s18 = scalar_lea.hbm %s396_s0, 256 }
   0x5   :  { %p253_p0 = scmp.ne.s32.totalorder %s396_s0, %s252_s18  ;;  %p256_p1 = scmp.lt.u32.totalorder %s252_s18, %s396_s0 }
   0x7   :  { %p258_p2 = pnand %p256_p1, %p253_p0 }
   0x9   :  { %261 = shalt.err (!%p258_p2)
}
   0xa   :  { %s262_s23 = scalar_lea.vmem %s18_s13, 256  ;;  %p267_p4 = scmp.lt.s32.totalorder %s18_s13, %s18_s13 }
   0xb   :  { %p263_p3 = scmp.ne.s32.totalorder %s18_s13, %s262_s23  ;;  %p268_p5 = scmp.lt.s32.totalorder %s262_s23, %s262_s23 }
   0xd   :  { %p269_p6 = por %p268_p5, %p267_p4 }
   0xf   :  { %p270_p7 = pnand %p269_p6, %p263_p3 }
  0x11   :  { %273 = shalt.err (!%p270_p7)
}
  0x12   :  { %20 = dma.hbm_to_vmem [thread:$0]  %s396_s0, 256, %s18_s13, [#allocation3]  }
  0x13   :  { %s274_s28 = scalar_lea.hbm %s397_s1, 1664 }
  0x14   :  { %p275_p8 = scmp.ne.s32.totalorder %s397_s1, %s274_s28  ;;  %p278_p9 = scmp.lt.u32.totalorder %s274_s28, %s397_s1 }
  0x16   :  { %p280_p10 = pnand %p278_p9, %p275_p8 }
  0x18   :  { %283 = shalt.err (!%p280_p10)
}
  0x19   :  { %s284_s6 = scalar_lea.vmem %s350_s15, 1664  ;;  %p289_p12 = scmp.lt.s32.totalorder %s350_s15, %s350_s15 }
  0x1a   :  { %p285_p11 = scmp.ne.s32.totalorder %s350_s15, %s284_s6  ;;  %p290_p13 = scmp.lt.s32.totalorder %s284_s6, %s284_s6 }
  0x1c   :  { %p291_p0 = por %p290_p13, %p289_p12 }
  0x1e   :  { %p292_p1 = pnand %p291_p0, %p285_p11 }
  0x20   :  { %295 = shalt.err (!%p292_p1)
}
  0x21   :  { %s326_s0 = smov 64   ;;  %s327_s7 = smov 4  }
  0x22   :  { %32 = dma.hbm_to_vmem [thread:$0]  %s397_s1, 1664, %s350_s15, [#allocation6], %s326_s0, %s326_s0, %s327_s7  }
  0x23   :  { %318 = dma.done.wait [#allocation3], 256  }
  0x24   :  { %319 = vsyncadd [#allocation3], 4294967040 }
  0x25   :  { %320 = dma.done.wait [#allocation6], 1664  }
  0x26   :  { %321 = vsyncadd [#allocation6], 4294965632  ;;  %v328_v0 = vmov 0   ;;  %v239_v1 = vld [vmem:[#allocation5] sm:$0xff]   ;;  %v240_v2 = vld [vmem:[#allocation5 + $0x8] sm:$0xff]   ;;  %vm157_vm0 = vcmask 654336  }
  0x27   :  { %161 = vmatprep.subr.bf16.mxu0 %v328_v0  ;;  %v241_v3 = vld [vmem:[#allocation5 + $0x10] sm:$0xff]   ;;  %v242_v4 = vld [vmem:[#allocation5 + $0x18] sm:$0xff]   ;;  %v243_v6 = vld [vmem:[#allocation5 + $0x20] sm:$0xff]   ;;  %s329_s11 = smov [#allocation7]  }
  0x28   :  { %162 = vmatpush1.bf16.msra.mxu0 %v239_v1  ;;  %v43_v5 = vld [vmem:[#allocation2 + $0x8] sm:$0xff]  ;;  %v244_v8 = vld [vmem:[#allocation5 + $0x28] sm:$0xff]   ;;  %v245_v9 = vld [vmem:[#allocation5 + $0x30] sm:$0xff]   ;;  %s208_s12 = sshll.u32 %s329_s11, 4  ;;  %s209_s12 = int_to_ptr.vmem [resolvable:$true] %s208_s12 }
  0x29   :  { %163 = vmatprep.subr.bf16.mxu0 %v328_v0  ;;  %v45_v7 = vpack.c.bf16 %v43_v5, %v43_v5  ;;  %v246_v10 = vld [vmem:[#allocation5 + $0x38] sm:$0xff]   ;;  %v247_v11 = vld [vmem:[#allocation5 + $0x40] sm:$0xff]   ;;  %v248_v12 = vld [vmem:[#allocation5 + $0x48] sm:$0xff]   ;;  %s296_s13 = scalar_lea.vmem %s209_s12, 128  ;;  %p301_p3 = scmp.lt.s32.totalorder %s209_s12, %s209_s12 }
  0x2a   :  { %v249_v13 = vld [vmem:[#allocation5 + $0x50] sm:$0xff]   ;;  %v250_v14 = vld [vmem:[#allocation5 + $0x58] sm:$0xff]   ;;  %v251_v15 = vld [vmem:[#allocation5 + $0x60] sm:$0xff]   ;;  %p297_p2 = scmp.ne.s32.totalorder %s209_s12, %s296_s13  ;;  %p302_p4 = scmp.lt.s32.totalorder %s296_s13, %s296_s13 }
  0x2b   :  { %232 = vmatprep.mubr.msk.bf16.mxu0 %vm157_vm0, %v45_v7  ;;  %v42_v16 = vld [vmem:[#allocation2] sm:$0xff] }
  0x2c   :  { %164 = vmatpush1.bf16.msra.mxu0 %v240_v2  ;;  %v44_v17 = vpack.c.bf16 %v42_v16, %v42_v16  ;;  %v218_v18 = vld [vmem:[%s398_s2] ss:$0 sm:$0xff]  ;;  %p303_p5 = por %p302_p4, %p301_p3 }
  0x2d   :  { %165 = vmatprep.subr.bf16.mxu0 %v328_v0 }
  0x2e   :  { %p304_p6 = pnand %p303_p5, %p297_p2 }
  0x30   :  { %166 = vmatpush1.bf16.msra.mxu0 %v241_v3 }
  0x31   :  { %167 = vmatprep.subr.bf16.mxu0 %v328_v0 }
  0x34   :  { %168 = vmatpush1.bf16.msra.mxu0 %v242_v4 }
  0x35   :  { %169 = vmatprep.subr.bf16.mxu0 %v328_v0 }
  0x38   :  { %170 = vmatpush1.bf16.msra.mxu0 %v243_v6 }
  0x39   :  { %171 = vmatprep.subr.bf16.mxu0 %v328_v0 }
  0x3c   :  { %172 = vmatpush1.bf16.msra.mxu0 %v244_v8 }
  0x3d   :  { %173 = vmatprep.subr.bf16.mxu0 %v328_v0 }
  0x40   :  { %174 = vmatpush1.bf16.msra.mxu0 %v245_v9 }
  0x41   :  { %175 = vmatprep.subr.bf16.mxu0 %v328_v0 }
  0x44   :  { %176 = vmatpush1.bf16.msra.mxu0 %v246_v10 }
  0x45   :  { %177 = vmatprep.subr.bf16.mxu0 %v328_v0 }
  0x48   :  { %178 = vmatpush1.bf16.msra.mxu0 %v247_v11 }
  0x49   :  { %179 = vmatprep.subr.bf16.mxu0 %v328_v0 }
  0x4c   :  { %180 = vmatpush1.bf16.msra.mxu0 %v248_v12 }
  0x4d   :  { %181 = vmatprep.subr.bf16.mxu0 %v328_v0 }
  0x50   :  { %182 = vmatpush1.bf16.msra.mxu0 %v249_v13 }
  0x51   :  { %183 = vmatprep.subr.bf16.mxu0 %v328_v0 }
  0x54   :  { %184 = vmatpush1.bf16.msra.mxu0 %v250_v14 }
  0x55   :  { %185 = vmatprep.subr.bf16.mxu0 %v328_v0 }
  0x58   :  { %186 = vmatpush1.bf16.msra.mxu0 %v251_v15 }
  0x5b   :  { %194 = vmatmul.mubr.bf16.vlgmr.msra.gmra.mrb[0].mxu0 %v44_v17 }
 0x12e   :  { %v195_v19 = vpop.f32.mrb[0].mxu0 }
 0x12f   :  { %v196_v20 = vadd.f32 %v218_v18, %v195_v19  ;;  %v197_v21 = vpop.f32.mrb[1].mxu0 }
 0x130   :  { %v198_v22 = vpop.f32.mrb[2].mxu0 }
 0x131   :  { %201 = vst [vmem:[#allocation7] sm:$0xff] %v196_v20  ;;  %v199_v23 = vpop.f32.mrb[3].mxu0 }
 0x132   :  { %307 = shalt.err (!%p304_p6)
}
 0x133   :  { %s308_s2 = scalar_lea.hbm %s399_s3, 128 }
 0x134   :  { %p309_p7 = scmp.ne.s32.totalorder %s399_s3, %s308_s2  ;;  %p312_p8 = scmp.lt.u32.totalorder %s308_s2, %s399_s3 }
 0x136   :  { %p314_p9 = pnand %p312_p8, %p309_p7 }
 0x138   :  { %317 = shalt.err (!%p314_p9)
}
 0x139   :  { %211 = dma.vmem_to_hbm [thread:$0]  %s209_s12, 128, %s399_s3, [#allocation4]  }
 0x13a   :  { %322 = dma.done.wait [#allocation4], 128  }
 0x13b   :  { %323 = vsyncadd [#allocation4], 4294967168 }
 0x13c   :  { %215 = vsyncpa [#allocation3], 1 }
 0x13d   :  { %216 = vsyncpa [#allocation6], 1 }
 0x13e   :  { %217 = vsyncpa [#allocation4], 1 }

</bundles_post_ra>
